<compile_context>
chip_gen: v5e
topology: v5e:2x2
jax: 0.10.0
libtpu: 0.0.40
codegen_flags: <defaults>
</compile_context>

<pallas_src>
import jax
import jax.numpy as jnp
from jax import lax
from jax.experimental import pallas as pl
from jax.experimental.pallas import tpu as pltpu

_LANE = 128
_SUBLANE = {4: 8, 2: 16, 1: 32}  # f32 / bf16 / int8-fp8 sublane tiles


def _round_up(x: int, m: int) -> int:
    return ((x + m - 1) // m) * m


def _linear_probe_kernel(x_ref, w_ref, b_ref, o_ref):
    # x_ref: (TB, D) VMEM (streamed)   w_ref: (1, D) VMEM (lane-dense, resident)
    # b_ref: (1,)   SMEM scalar        o_ref: (1, TB) VMEM (lane-dense logits)
    x = x_ref[...]
    w = w_ref[...]
    # (1, D) x (TB, D) contracted on D -> (1, TB): batch elements land on the lane
    # axis, so stores are lane-dense and the MXU accumulates in f32.
    y = lax.dot_general(
        w, x,
        dimension_numbers=(((1,), (1,)), ((), ())),
        preferred_element_type=jnp.float32,
    )
    o_ref[...] = y + b_ref[0]


def mlp_forward(image_latent, weight, bias):
    """LinearProbe.MLP forward.

    image_latent: (B, D); weight: (1, D) / (D, 1) / (D,); bias: (1,)  ->  (B,) f32 logits.
    """
    x = image_latent
    B, D = x.shape
    itemsize = x.dtype.itemsize
    sublane = _SUBLANE.get(itemsize, 8)

    # NOTE: weight is kept in the activation dtype (matches a fused-producer setup);
    # accumulation is always f32 via preferred_element_type.
    w = jnp.asarray(weight).reshape(1, D).astype(x.dtype)   # lane-dense weight row
    b = jnp.asarray(bias).reshape(1).astype(jnp.float32)

    # ---- per-generation VMEM budget for the streamed (double-buffered) blocks ----
    try:
        vmem_cap = int(pltpu.get_tpu_info().vmem_capacity_bytes)
    except Exception:  # pragma: no cover - conservative fallback (v7x per-core VMEM)
        vmem_cap = 64 * 1024 * 1024
    # double-buffered x + out stream <= 3/8 of physical VMEM:
    #   v7x (64 MiB) -> 24 MiB ; v5e/v6e (128 MiB) -> 48 MiB.
    stream_budget = min(vmem_cap * 3 // 8, 48 * 1024 * 1024)

    # VMEM bytes per batch row (lane/sublane padded) for the x tile and the (1, TB) output.
    x_row_bytes = _round_up(D, _LANE) * itemsize
    out_row_bytes = 8 * 4            # f32 output row, padded to 8 sublanes
    n_buf = 2                        # default double-buffering
    tb_budget = (stream_budget // (n_buf * (x_row_bytes + out_row_bytes))) // _LANE * _LANE

    # Megacore: aim for >= ~8 grid steps on large batches (so v7x's two TensorCores both
    # stream; harmless on 1-TC chips), but never shrink blocks below ~1024 rows.
    tb_split = max(1024, _round_up(pl.cdiv(B, 8), _LANE))
    tb = max(_LANE, min(tb_budget, tb_split))
    if tb >= B:
        tb = B                       # single block == full arrays (no alignment needed)
    grid = (pl.cdiv(B, tb),)         # ragged last block clipped by Pallas (no jnp.pad copy)

    # Raise the scoped-VMEM limit just enough for the chosen blocks (+ headroom),
    # never above physical capacity.
    x_blk = _round_up(tb, sublane) * x_row_bytes
    out_blk = 8 * _round_up(tb, _LANE) * 4
    w_blk = 8 * _round_up(D, _LANE) * 4
    vmem_limit = int(min(vmem_cap, n_buf * (x_blk + out_blk + w_blk) + 16 * 1024 * 1024))

    out = pl.pallas_call(
        _linear_probe_kernel,
        out_shape=jax.ShapeDtypeStruct((1, B), jnp.float32),
        grid=grid,
        in_specs=[
            pl.BlockSpec((tb, D), lambda i: (i, 0)),            # x: streamed batch tiles
            pl.BlockSpec((1, D), lambda i: (0, 0)),             # weight: lane-dense, resident
            pl.BlockSpec(memory_space=pltpu.MemorySpace.SMEM),  # bias: scalar in SMEM
        ],
        out_specs=pl.BlockSpec((1, tb), lambda i: (0, i)),      # lane-dense logits slab
        compiler_params=pltpu.CompilerParams(
            dimension_semantics=("parallel",),   # batch tiles independent -> megacore-shardable
            vmem_limit_bytes=vmem_limit,
        ),
    )(x, w, b)

    # (1, B) -> (B,)  == logits.squeeze(1)
    return out[0]


if __name__ == "__main__":
    key = jax.random.PRNGKey(0)
    k_x, k_w, k_b, k_x2, k_w2, k_b2 = jax.random.split(key, 6)

    # --- primary demo at small shapes (batch=2, img_embedding_dim=32) ---
    B, D = 2, 32
    bound = 1.0 / (D ** 0.5)  # mimic torch.nn.Linear init range
    weight = jax.random.uniform(k_w, (1, D), jnp.float32, -bound, bound)  # torch layout (out, in)
    bias = jax.random.uniform(k_b, (1,), jnp.float32, -bound, bound)
    image_latent = jax.random.normal(k_x, (B, D), dtype=jnp.float32)

    logits = mlp_forward(image_latent, weight, bias)
    jax.block_until_ready(logits)

    ref = (image_latent @ weight.reshape(D, 1))[:, 0] + bias[0]
    assert logits.shape == (B,)
    assert jnp.allclose(logits, ref, atol=1e-4, rtol=1e-4), (logits, ref)

    # --- secondary check: ragged batch exercising multi-step grid + clipped last block ---
    B2, D2 = 2051, 64
    w2 = jax.random.uniform(k_w2, (1, D2), jnp.float32, -0.1, 0.1)
    b2 = jax.random.uniform(k_b2, (1,), jnp.float32, -0.1, 0.1)
    x2 = jax.random.normal(k_x2, (B2, D2), dtype=jnp.float32)

    logits2 = mlp_forward(x2, w2, b2)
    jax.block_until_ready(logits2)
    ref2 = (x2 @ w2.reshape(D2, 1))[:, 0] + b2[0]
    assert logits2.shape == (B2,)
    assert jnp.allclose(logits2, ref2, atol=1e-3, rtol=1e-3), float(jnp.max(jnp.abs(logits2 - ref2)))

    print("KERNEL_OK")
</pallas_src>

<mosaic_0001>
module attributes {stable_mosaic.version = 11 : i64} {
  func.func @_linear_probe_kernel(%arg0: i32, %arg1: memref<2x32xf32, #tpu.memory_space<vmem>>, %arg2: memref<1x32xf32, #tpu.memory_space<vmem>>, %arg3: memref<1xf32, #tpu.memory_space<smem>>, %arg4: memref<1x2xf32, #tpu.memory_space<vmem>>) attributes {dimension_semantics = [#tpu.dimension_semantics<parallel>], iteration_bounds = array<i64: 1>, scalar_prefetch = 0 : i64, scratch_operands = 0 : i64, tpu.core_type = #tpu.core_type<tc>, window_params = [{transform_indices = @transform_0, window_bounds = array<i64: 2, 32>}, {pipeline_mode = #tpu.pipeline_mode<synchronous>, transform_indices = @transform_1, window_bounds = array<i64: 1, 32>}, {transform_indices = @transform_2, window_bounds = array<i64: 1>}, {transform_indices = @transform_3, window_bounds = array<i64: 1, 2>}]} {
    %c0 = arith.constant 0 : index
    %c0_0 = arith.constant 0 : index
    %0 = vector.load %arg1[%c0, %c0_0] : memref<2x32xf32, #tpu.memory_space<vmem>>, vector<2x32xf32>
    %c0_1 = arith.constant 0 : index
    %c0_2 = arith.constant 0 : index
    %1 = vector.load %arg2[%c0_1, %c0_2] : memref<1x32xf32, #tpu.memory_space<vmem>>, vector<1x32xf32>
    %cst = arith.constant dense<0.000000e+00> : vector<1x2xf32>
    %2 = tpu.matmul %1, %0, %cst {dimension_numbers = #tpu.dot_dimension_numbers<[1], [1], [0], [0], [0, 0, 1, 0], [], []>} : vector<1x32xf32>, vector<2x32xf32>, vector<1x2xf32> -> vector<1x2xf32>
    %c0_3 = arith.constant 0 : index
    %3 = memref.load %arg3[%c0_3] : memref<1xf32, #tpu.memory_space<smem>>
    %4 = vector.broadcast %3 : f32 to vector<1x2xf32>
    %5 = arith.addf %2, %4 : vector<1x2xf32>
    %c0_4 = arith.constant 0 : index
    %c0_5 = arith.constant 0 : index
    %6 = vector.load %arg4[%c0_4, %c0_5] : memref<1x2xf32, #tpu.memory_space<vmem>>, vector<1x2xf32>
    tpu.vector_store %arg4[%c0_4, %c0_5], %5 {strides = array<i32>} : memref<1x2xf32, #tpu.memory_space<vmem>>, vector<1x2xf32>,
    return
  }
  func.func @transform_0(%arg0: i32) -> (i32, i32) {
    %c0_i32 = arith.constant 0 : i32
    %c0_i32_0 = arith.constant 0 : i32
    return %arg0, %c0_i32 : i32, i32
  }
  func.func @transform_1(%arg0: i32) -> (i32, i32) {
    %c0_i32 = arith.constant 0 : i32
    %c0_i32_0 = arith.constant 0 : i32
    %c0_i32_1 = arith.constant 0 : i32
    return %c0_i32, %c0_i32_0 : i32, i32
  }
  func.func @transform_2(%arg0: i32) -> i32 {
    %c0_i32 = arith.constant 0 : i32
    %c0_i32_0 = arith.constant 0 : i32
    return %c0_i32 : i32
  }
  func.func @transform_3(%arg0: i32) -> (i32, i32) {
    %c0_i32 = arith.constant 0 : i32
    %c0_i32_0 = arith.constant 0 : i32
    return %c0_i32, %arg0 : i32, i32
  }
}

</mosaic_0001>

<bundles_post_ra>
// kernel: tpu_custom_call.1
= control target key start
LH: loop header
LB: loop body
LE: loop exit
PB: predicated region body
PF: predicated region fallthrough
CT: control target
= control target key end

     0   :  { %9 = vsyncpa [#allocation4], 0  ;;  %s170_s0 = inlined_call_operand.vmem [shape: f32[2,32], index: 0, kind: input, shape index: {}]   ;;  %s171_s1 = inlined_call_operand.hbm [shape: f32[1,32], index: 1, kind: input, shape index: {}]   ;;  %s172_s2 = inlined_call_operand.<no memory space> [shape: f32[1], index: 2, kind: input, shape index: {}]   ;;  %s173_s3 = inlined_call_operand.hbm [shape: f32[1,2], index: 3, kind: output, shape index: {}]  }
   0x1   :  { %10 = vsyncpa [#allocation5], 0  ;;  %s18_s14 = sshll.u32 %s171_s1, 4  ;;  %s136_s15 = smov [#allocation3]   ;;  %s19_s14 = int_to_ptr.hbm [resolvable:$true] %s18_s14 }
   0x2   :  { %s20_s16 = sshll.u32 %s136_s15, 4  ;;  %s21_s16 = int_to_ptr.vmem [resolvable:$true] %s20_s16 }
   0x3   :  { %23 = dma.hbm_to_vmem [thread:$0]  %s19_s14, 16, %s21_s16, [#allocation4]  }
   0x4   :  { %132 = dma.done.wait [#allocation4], 16  }
   0x5   :  { %133 = vsyncadd [#allocation4], 4294967280  ;;  %vm34_vm0 = vcmask 261120   ;;  %v30_v0 = vld [vmem:[%s170_s0] sm:$0x3]  ;;  %v33_v2 = vstv %s172_s2  ;;  %s137_s1 = smov [#allocation6]  }
   0x6   :  { %80 = vmatpush.xpose.msk.msra.mxu0 %vm34_vm0, %v30_v0  ;;  %v31_v1 = vld [vmem:[#allocation3] sm:$0x1]  ;;  %s68_s21 = sshll.u32 %s137_s1, 4  ;;  %s70_s24 = sshll.u32 %s173_s3, 4  ;;  %vm61_vm1 = vcmask 8192   ;;  %s69_s21 = int_to_ptr.vmem [resolvable:$true] %s68_s21  ;;  %s71_s24 = int_to_ptr.hbm [resolvable:$true] %s70_s24 }
   0x9   :  { %81 = vmatmul.msk.f32.vlgmr.msra.gmra.mxu0 %vm34_vm0, %v31_v1 }
  0x86   :  { %v58_v3 = vpop.f32.mrf.mxu0 }
  0x87   :  { %v59_v4 = vadd.f32 %v58_v3, %v33_v2 }
  0x89   :  { %62 = vst.msk [vmem:[#allocation6] sm:$0x1] %vm61_vm1, %v59_v4 }
  0x8a   :  { %73 = dma.vmem_to_hbm [thread:$0]  %s69_s21, 16, %s71_s24, [#allocation5]  }
  0x8b   :  { %134 = dma.done.wait [#allocation5], 16  }
  0x8c   :  { %135 = vsyncadd [#allocation5], 4294967280 }
  0x8d   :  { %78 = vsyncpa [#allocation4], 1 }
  0x8e   :  { %79 = vsyncpa [#allocation5], 1 }

</bundles_post_ra>
